<compile_context>
chip_gen: v7x
topology: tpu7x:2x2x1
jax: 0.10.0
libtpu: 0.0.40
codegen_flags: <defaults>
</compile_context>

<pallas_src>
import jax
import jax.numpy as jnp
from jax.experimental import pallas as pl
from jax.experimental.pallas import tpu as pltpu

_LANES = 128        # vreg lane width; last dim of every tile
_TR_MAX = 8192      # max rows per tile -> 8192*128*4 B = 4 MiB per buffer
_MIN_GRID_STEPS = 8  # keep the pipeline (and v7x's 2 TCs) busy for larger N


def _affine_kernel(x_ref, w_ref, b_ref, o_ref):
    # x_ref/o_ref: (TR, 128) VMEM tiles. w_ref/b_ref: (1,) SMEM scalars.
    o_ref[...] = x_ref[...] * w_ref[0] + b_ref[0]


def _choose_tile_rows(rows: int) -> int:
    """Pick rows-per-tile: big enough to amortize step overhead, small enough
    that the grid has several steps (pipelining / megacore) for larger N."""
    if rows <= 8:
        return rows                       # block dims == full array dims (ok)
    tr = pl.cdiv(rows, _MIN_GRID_STEPS)   # aim for >= ~8 grid steps
    tr = -(-tr // 8) * 8                  # round up to a sublane multiple
    return max(8, min(_TR_MAX, tr))


def _affine_pallas(x_slab, w_s, b_s):
    rows = x_slab.shape[0]
    tr = _choose_tile_rows(rows)
    grid = (pl.cdiv(rows, tr),)           # ragged last block is masked by Pallas
    return pl.pallas_call(
        _affine_kernel,
        out_shape=jax.ShapeDtypeStruct((rows, _LANES), jnp.float32),
        grid_spec=pltpu.PrefetchScalarGridSpec(
            num_scalar_prefetch=0,
            grid=grid,
            in_specs=[
                # Lane-dense, double-buffered (default Buffered(2)) input tiles.
                pl.BlockSpec((tr, _LANES), lambda i: (i, 0)),
                # Scalar parameters: whole (1,) arrays in SMEM, no per-step DMA.
                pl.BlockSpec(memory_space=pltpu.MemorySpace.SMEM),
                pl.BlockSpec(memory_space=pltpu.MemorySpace.SMEM),
            ],
            out_specs=pl.BlockSpec((tr, _LANES), lambda i: (i, 0)),
        ),
        compiler_params=pltpu.CompilerParams(
            # Independent tiles; lets Mosaic shard across v7x's 2 TensorCores.
            dimension_semantics=("parallel",),
        ),
    )(x_slab, w_s, b_s)


def linear_regression_forward(x, weight, bias):
    """x: (N, 1) f32, weight: (1, 1) f32, bias: (1,) f32 -> (N, 1) f32."""
    n, f = x.shape
    assert f == 1, "nn.Linear(1, 1) expects in_features == 1"

    x = x.astype(jnp.float32)
    w_s = weight.reshape(1).astype(jnp.float32)
    b_s = bias.reshape(1).astype(jnp.float32)

    n_main = (n // _LANES) * _LANES       # 128-aligned prefix handled by kernel
    rows = n_main // _LANES

    if rows > 0 and n_main == n:
        # Fast path: zero-copy bitcast (N,1) -> (rows,128) -> kernel -> (N,1).
        out_slab = _affine_pallas(x.reshape(rows, _LANES), w_s, b_s)
        return out_slab.reshape(n, 1)

    # General path: kernel on the aligned prefix, tiny fused XLA x*w+b on the
    # ragged (< 128 element) tail, then stitch together.
    # TODO(synk): a fully zero-copy unaligned path would need manual DMA
    # (memory_space=pl.ANY + make_async_copy with pl.ds-clamped last chunk).
    x_flat = x.reshape(-1)
    pieces = []
    if rows > 0:
        main = _affine_pallas(x_flat[:n_main].reshape(rows, _LANES), w_s, b_s)
        pieces.append(main.reshape(-1))
    pieces.append(x_flat[n_main:] * w_s[0] + b_s[0])
    return jnp.concatenate(pieces).reshape(n, 1)


if __name__ == "__main__":
    key = jax.random.PRNGKey(0)
    kx, kw, kb = jax.random.split(key, 3)

    # Small batch consistent with nn.Linear(1, 1): 2053 samples of 1 feature.
    # (16 full lane-rows go through the Pallas kernel over a 2-step grid, plus
    #  a 5-element ragged tail through the XLA epilogue.)
    n = 2053
    x = jax.random.normal(kx, (n, 1), dtype=jnp.float32)

    # Deterministic params (mimics nn.Linear's uniform init for in_features=1).
    weight = jax.random.uniform(kw, (1, 1), minval=-1.0, maxval=1.0,
                                dtype=jnp.float32)
    bias = jax.random.uniform(kb, (1,), minval=-1.0, maxval=1.0,
                              dtype=jnp.float32)

    fwd = jax.jit(linear_regression_forward)
    y = fwd(x, weight, bias)
    y = jax.block_until_ready(y)

    # Reference check in plain JAX (x @ W^T + b).
    y_ref = x @ weight.T + bias
    assert y.shape == (n, 1)
    assert jnp.allclose(y, y_ref, atol=1e-6), "mismatch vs reference"

    print("KERNEL_OK")
</pallas_src>

<mosaic_0001>
module attributes {stable_mosaic.version = 11 : i64} {
  func.func @_affine_kernel(%arg0: i32, %arg1: memref<8x128xf32, #tpu.memory_space<vmem>>, %arg2: memref<1xf32, #tpu.memory_space<smem>>, %arg3: memref<1xf32, #tpu.memory_space<smem>>, %arg4: memref<8x128xf32, #tpu.memory_space<vmem>>) attributes {dimension_semantics = [#tpu.dimension_semantics<parallel>], iteration_bounds = array<i64: 2>, scalar_prefetch = 0 : i64, scratch_operands = 0 : i64, tpu.core_type = #tpu.core_type<tc>, window_params = [{transform_indices = @transform_0, window_bounds = array<i64: 8, 128>}, {transform_indices = @transform_1, window_bounds = array<i64: 1>}, {transform_indices = @transform_2, window_bounds = array<i64: 1>}, {transform_indices = @transform_3, window_bounds = array<i64: 8, 128>}]} {
    %c0 = arith.constant 0 : index
    %c0_0 = arith.constant 0 : index
    %0 = vector.load %arg1[%c0, %c0_0] : memref<8x128xf32, #tpu.memory_space<vmem>>, vector<8x128xf32>
    %c0_1 = arith.constant 0 : index
    %1 = memref.load %arg2[%c0_1] : memref<1xf32, #tpu.memory_space<smem>>
    %2 = vector.broadcast %1 : f32 to vector<8x128xf32>
    %3 = arith.mulf %0, %2 : vector<8x128xf32>
    %c0_2 = arith.constant 0 : index
    %4 = memref.load %arg3[%c0_2] : memref<1xf32, #tpu.memory_space<smem>>
    %5 = vector.broadcast %4 : f32 to vector<8x128xf32>
    %6 = arith.addf %3, %5 : vector<8x128xf32>
    %c0_3 = arith.constant 0 : index
    %c0_4 = arith.constant 0 : index
    %7 = vector.load %arg4[%c0_3, %c0_4] : memref<8x128xf32, #tpu.memory_space<vmem>>, vector<8x128xf32>
    tpu.vector_store %arg4[%c0_3, %c0_4], %6 {strides = array<i32>} : memref<8x128xf32, #tpu.memory_space<vmem>>, vector<8x128xf32>,
    return
  }
  func.func @transform_0(%arg0: i32) -> (i32, i32) {
    %c0_i32 = arith.constant 0 : i32
    %c0_i32_0 = arith.constant 0 : i32
    return %arg0, %c0_i32 : i32, i32
  }
  func.func @transform_1(%arg0: i32) -> i32 {
    %c0_i32 = arith.constant 0 : i32
    %c0_i32_0 = arith.constant 0 : i32
    return %c0_i32 : i32
  }
  func.func @transform_2(%arg0: i32) -> i32 {
    %c0_i32 = arith.constant 0 : i32
    %c0_i32_0 = arith.constant 0 : i32
    return %c0_i32 : i32
  }
  func.func @transform_3(%arg0: i32) -> (i32, i32) {
    %c0_i32 = arith.constant 0 : i32
    %c0_i32_0 = arith.constant 0 : i32
    return %arg0, %c0_i32 : i32, i32
  }
}

</mosaic_0001>

<bundles_post_ra>
// kernel: linear_regression_forward.1
= control target key start
LH: loop header
LB: loop body
LE: loop exit
PB: predicated region body
PF: predicated region fallthrough
CT: control target
= control target key end

     0   :  { %s250_s16 = smov 0   ;;  %s286_s0 = inlined_call_operand.vmem [shape: f32[16,128], index: 0, kind: input, shape index: {}]   ;;  %s287_s1 = inlined_call_operand.<no memory space> [shape: f32[1], index: 1, kind: input, shape index: {}]   ;;  %s288_s2 = inlined_call_operand.<no memory space> [shape: f32[1], index: 2, kind: input, shape index: {}]   ;;  %s289_s3 = inlined_call_operand.vmem [shape: f32[16,128], index: 3, kind: output, shape index: {}]  }
   0x1   :  { %8 = sst [smem:[#allocation2]] %s287_s1 }
   0x2   :  { %9 = sst [smem:[#allocation3]] %s288_s2 }
   0x3 LB: > { %s229_s17 = sadd.s32 4294967295, %s252_s16   ;;  %p233_p0 = scmp.ge.s32.totalorder %s252_s16, 1  ;;  %s252_s16 = sphi %s250_s16, %s15_s16  }
   0x4   : > { %p138_p1 = scmp.lt.s32.totalorder %s252_s16, 3 }
   0x6   : > { %p139_p2 = pnand %p233_p0, %p138_p1 }
   0x7   : > { %p160_p3 = scmp.lt.s32.totalorder (!%p139_p2), %s229_s17, 1  ;;  %s169_s18 = sld [smem:[#allocation2]] (!%p139_p2) }
   0x8   : > { %142 = sbr.rel (%p139_p2) target bundleno = 24 (0x18), region = 32  ;;  %s172_s19 = sld [smem:[#allocation3]] (!%p139_p2) }
   0xd   : > { %v170_v1 = vstv (!%p139_p2), %s169_s18 }
   0xe   : > { %v173_v3 = vstv (!%p139_p2), %s172_s19 }
   0xf   : > { %s291_s17 = smov (!%p160_p3, %s229_s17), 1 }
  0x10   : > { %s234_s20 = sshll.u32 %s291_s17, 3 }
  0x11   : > { %s163_s22 = scalar_lea.vmem %s286_s0, %s234_s20  ;;  %s167_s24 = scalar_lea.vmem %s289_s3, %s234_s20 }
  0x12   : > { %v168_v0 = vld [vmem:[%s163_s22] sm:$0xff] }
  0x13   : > { %v171_v2 = vmul.f32 %v170_v1, %v168_v0 }
  0x15   : > { %v174_v4 = vadd.f32 %v173_v3, %v171_v2 }
  0x17   : > { %175 = vst [vmem:[%s167_s24] sm:$0xff] %v174_v4 }
  0x18 PF: > { %s15_s16 = sadd.s32 1, %s252_s16  }
  0x19   : > { %p12_p4 = scmp.ge.s32.totalorder %s15_s16, 4  }
  0x1b   :  { %14 = sbr.rel (!%p12_p4) target bundleno = 3 (0x3), region = 62 }

</bundles_post_ra>
